<compile_context>
chip_gen: v7x
topology: tpu7x:2x2x1
jax: 0.10.0
libtpu: 0.0.40
codegen_flags: <defaults>
</compile_context>

<pallas_src>
import jax
import jax.numpy as jnp
from jax.experimental import pallas as pl
from jax.experimental.pallas import tpu as pltpu


def _gsoft_kernel(x_ref, w_ref, b_ref, o_ref, acc_ref):
    """(i, j, k) tile of y = x @ W_fused + b with an f32 VMEM accumulator."""
    k = pl.program_id(2)

    @pl.when(k == 0)
    def _init():
        acc_ref[...] = jnp.zeros_like(acc_ref)

    acc_ref[...] += jnp.dot(x_ref[...], w_ref[...],
                            preferred_element_type=jnp.float32)

    @pl.when(k == pl.num_programs(2) - 1)
    def _finalize():
        o_ref[...] = (acc_ref[...] + b_ref[...]).astype(o_ref.dtype)


def _round_up(v, m):
    return (v + m - 1) // m * m


def _pick_tile(dim, target, align):
    """Tile size (multiple of `align`, <= target) that minimizes padding of `dim`,
    preferring the largest such tile.  Never goes below half the target so MXU
    tiles stay large."""
    dim_p = _round_up(dim, align)
    hi = min(_round_up(target, align), dim_p)
    lo = min(max(align, (hi // 2 // align) * align), dim_p)
    best_c, best_pad = None, None
    c = lo
    while c <= hi:
        pad = _round_up(dim_p, c)
        if best_pad is None or pad < best_pad or (pad == best_pad and c > best_c):
            best_c, best_pad = c, pad
        c += align
    return best_c, best_pad


def gsoft_prepare(q_blocks, weight, scale, bias, *, tn=512, tk=512,
                  compute_dtype=None):
    """One-time parameter prep (hoist out of the per-call forward path).

    Folds the per-output scale and the block-diagonal orthogonal Q into the weight,
    transposes it to a lane-dense (K, N) MXU RHS, and pads everything to
    tile-aligned shapes.  The returned dict can be cached and reused across calls.
    """
    out_features, in_features = weight.shape
    nblocks, bs, _ = q_blocks.shape
    assert nblocks * bs == in_features, "in_features must equal nblocks * block_size"

    cdt = jnp.float32 if compute_dtype is None else compute_dtype

    # y = s * ((x @ Q_bd) @ W.T) + b  ==  x @ (Q_bd @ (s[:,None] * W).T) + b
    w_eff = weight if scale is None else scale[:, None] * weight
    w_t = w_eff.T.astype(jnp.float32)                                    # (K, N)
    w_fused = jnp.einsum(
        "nbc,ncj->nbj",
        q_blocks.astype(jnp.float32),
        w_t.reshape(nblocks, bs, out_features),
        preferred_element_type=jnp.float32,
    ).reshape(in_features, out_features)                                 # Q_bd @ W.T

    tk, Kp = _pick_tile(in_features, tk, 128)
    tn, Np = _pick_tile(out_features, tn, 128)

    if (Kp, Np) == w_fused.shape:
        wp = w_fused.astype(cdt)
    else:
        wp = jnp.zeros((Kp, Np), cdt).at[:in_features, :out_features].set(
            w_fused.astype(cdt))

    b = (jnp.zeros((out_features,), jnp.float32) if bias is None
         else bias.astype(jnp.float32))
    bp = jnp.zeros((1, Np), jnp.float32).at[0, :out_features].set(b)

    return dict(wp=wp, bp=bp, tk=tk, tn=tn, Kp=Kp, Np=Np,
                in_features=in_features, out_features=out_features,
                compute_dtype=cdt)


def gsoft_forward_prepared(x, params, *, tm=512):
    """Fused GSOFT forward using prepared/cached parameters."""
    in_features = params["in_features"]
    out_features = params["out_features"]
    Kp, Np, tk, tn = params["Kp"], params["Np"], params["tk"], params["tn"]
    wp, bp, cdt = params["wp"], params["bp"], params["compute_dtype"]

    assert x.shape[-1] == in_features
    out_dtype = x.dtype
    lead = x.shape[:-1]
    x2d = x.reshape(-1, in_features)
    M = x2d.shape[0]

    # bf16 inputs need a (16, 128)-friendly sublane tile.
    m_align = 16 if jnp.dtype(cdt) == jnp.dtype(jnp.bfloat16) else 8
    tm, Mp = _pick_tile(M, tm, m_align)

    # Megacore (v7x): if the parallel grid collapsed to one (M, N) tile, split the
    # M axis in two so both TensorCores get work.
    Mp0 = _round_up(M, m_align)
    if (Mp // tm) * (Np // tn) == 1 and Mp0 > m_align:
        tm = _round_up((Mp0 + 1) // 2, m_align)
        Mp = 2 * tm

    if (Mp, Kp) == x2d.shape and x2d.dtype == jnp.dtype(cdt):
        xp = x2d
    else:
        xp = jnp.zeros((Mp, Kp), cdt).at[:M, :in_features].set(x2d.astype(cdt))

    grid = (Mp // tm, Np // tn, Kp // tk)

    # Double-buffered inputs + f32 accumulator + double-buffered output, with
    # headroom, capped at 48 MiB so v7x's 64 MiB physical VMEM is not exhausted.
    isz = jnp.dtype(cdt).itemsize
    est = (2 * (tm * tk + tk * tn + tn) * isz
           + tm * tn * 4
           + 2 * tm * tn * jnp.dtype(out_dtype).itemsize)
    vmem_limit = int(min(48 << 20, max(32 << 20, 2 * est + (4 << 20))))

    out = pl.pallas_call(
        _gsoft_kernel,
        out_shape=jax.ShapeDtypeStruct((Mp, Np), out_dtype),
        grid_spec=pltpu.PrefetchScalarGridSpec(
            num_scalar_prefetch=0,
            grid=grid,
            in_specs=[
                pl.BlockSpec((tm, tk), lambda i, j, k: (i, k)),   # x rows
                pl.BlockSpec((tk, tn), lambda i, j, k: (k, j)),   # fused Q_bd @ (s*W).T
                pl.BlockSpec((1, tn), lambda i, j, k: (0, j)),    # bias
            ],
            out_specs=pl.BlockSpec((tm, tn), lambda i, j, k: (i, j)),
            scratch_shapes=[pltpu.VMEM((tm, tn), jnp.float32)],
        ),
        compiler_params=pltpu.CompilerParams(
            dimension_semantics=("parallel", "parallel", "arbitrary"),
            vmem_limit_bytes=vmem_limit),
    )(xp, wp, bp)

    return out[:M, :out_features].reshape(*lead, out_features)


def gsoft_forward(x, q_blocks, weight, scale, bias, *, tm=512, tn=512, tk=512,
                  compute_dtype=None):
    """Convenience wrapper: prepare (fold + pad) then run the fused GEMM kernel."""
    params = gsoft_prepare(q_blocks, weight, scale, bias, tn=tn, tk=tk,
                           compute_dtype=compute_dtype)
    return gsoft_forward_prepared(x, params, tm=tm)


def cayley_blocks(a_blocks):
    """A_k (nblocks, bs, bs) -> orthogonal Q_k via Cayley map (plain-JAX param setup)."""
    nblocks, bs, _ = a_blocks.shape
    skew = a_blocks - jnp.swapaxes(a_blocks, -1, -2)
    eye = jnp.eye(bs, dtype=a_blocks.dtype)[None]
    return jax.vmap(jnp.linalg.solve)(eye - skew, eye + skew)   # (I - S)^{-1} (I + S)


def reference_forward(x, q_blocks, weight, scale, bias):
    """Pure-JAX reference matching the PyTorch forward."""
    nblocks, bs, _ = q_blocks.shape
    lead = x.shape[:-1]
    xb = x.reshape(*lead, nblocks, bs)
    zb = jnp.einsum("...nb,nbc->...nc", xb, q_blocks)
    z = zb.reshape(*lead, nblocks * bs)
    y = z @ weight.T
    if scale is not None:
        y = scale * y
    if bias is not None:
        y = y + bias
    return y


if __name__ == "__main__":
    key = jax.random.PRNGKey(0)
    k_x, k_w, k_b, k_a, k_x2, k_w2, k_b2, k_a2 = jax.random.split(key, 8)

    # ---- small case (module-implied toy shapes) ------------------------------
    batch, seq = 2, 8
    in_features, out_features, nblocks = 32, 32, 4
    bs = in_features // nblocks

    x = jax.random.normal(k_x, (batch, seq, in_features), jnp.float32)
    weight = 0.1 * jax.random.normal(k_w, (out_features, in_features), jnp.float32)
    bias = 0.1 * jax.random.normal(k_b, (out_features,), jnp.float32)
    gsoft_s = jnp.ones((out_features,), jnp.float32)            # scale=True init
    a_blocks = 0.1 * jax.random.normal(k_a, (nblocks, bs, bs), jnp.float32)
    q_blocks = cayley_blocks(a_blocks)

    out = gsoft_forward(x, q_blocks, weight, gsoft_s, bias)
    jax.block_until_ready(out)
    ref = reference_forward(x, q_blocks, weight, gsoft_s, bias)
    assert out.shape == ref.shape
    assert jnp.allclose(out, ref, rtol=2e-5, atol=2e-5), "small f32 mismatch"

    # ---- multi-tile case (exercises M/N/K tiling, padding, prep hoisting) ----
    batch2, seq2 = 4, 128                       # M = 512
    in2, out2, nb2 = 256, 320, 8                # N = 320 -> Np = 384 (tn = 384)
    bs2 = in2 // nb2
    x2 = jax.random.normal(k_x2, (batch2, seq2, in2), jnp.float32)
    w2 = 0.05 * jax.random.normal(k_w2, (out2, in2), jnp.float32)
    b2 = 0.1 * jax.random.normal(k_b2, (out2,), jnp.float32)
    s2 = 1.0 + 0.01 * jnp.arange(out2, dtype=jnp.float32)
    a2 = 0.1 * jax.random.normal(k_a2, (nb2, bs2, bs2), jnp.float32)
    q2 = cayley_blocks(a2)

    params2 = gsoft_prepare(q2, w2, s2, b2)                      # hoisted, reusable
    out_tiled = gsoft_forward_prepared(x2, params2)
    jax.block_until_ready(out_tiled)
    ref2 = reference_forward(x2, q2, w2, s2, b2)
    assert jnp.allclose(out_tiled, ref2, rtol=1e-3, atol=1e-3), "tiled f32 mismatch"

    out_tiled_again = gsoft_forward_prepared(x2, params2)        # reuse prepared params
    jax.block_until_ready(out_tiled_again)
    assert jnp.allclose(out_tiled_again, ref2, rtol=1e-3, atol=1e-3)

    # ---- bf16 MXU inputs, f32 accumulation (relaxed tolerance) ---------------
    out_bf16 = gsoft_forward(x2, q2, w2, s2, b2, compute_dtype=jnp.bfloat16)
    jax.block_until_ready(out_bf16)
    assert jnp.allclose(out_bf16, ref2, rtol=1e-1, atol=1e-1), "bf16 mismatch"

    print("KERNEL_OK")
</pallas_src>

<mosaic_0001>
module attributes {stable_mosaic.version = 11 : i64} {
  func.func @_gsoft_kernel(%arg0: i32, %arg1: i32, %arg2: i32, %arg3: memref<8x128xf32, #tpu.memory_space<vmem>>, %arg4: memref<128x128xf32, #tpu.memory_space<vmem>>, %arg5: memref<1x128xf32, #tpu.memory_space<vmem>>, %arg6: memref<8x128xf32, #tpu.memory_space<vmem>>, %arg7: memref<8x128xf32, #tpu.memory_space<vmem>>) attributes {dimension_semantics = [#tpu.dimension_semantics<parallel>, #tpu.dimension_semantics<parallel>, #tpu.dimension_semantics<arbitrary>], iteration_bounds = array<i64: 2, 1, 1>, scalar_prefetch = 0 : i64, scratch_operands = 1 : i64, tpu.core_type = #tpu.core_type<tc>, window_params = [{transform_indices = @transform_0, window_bounds = array<i64: 8, 128>}, {transform_indices = @transform_1, window_bounds = array<i64: 128, 128>}, {transform_indices = @transform_2, window_bounds = array<i64: 1, 128>}, {transform_indices = @transform_3, window_bounds = array<i64: 8, 128>}]} {
    %c0_i32 = arith.constant 0 : i32
    %0 = arith.cmpi eq, %arg2, %c0_i32 : i32
    %1 = arith.extui %0 : i1 to i32
    %c0_i32_0 = arith.constant 0 : i32
    %2 = arith.cmpi ne, %1, %c0_i32_0 : i32
    scf.if %2 {
      %cst_10 = arith.constant 0.000000e+00 : f32
      %12 = vector.broadcast %cst_10 : f32 to vector<8x128xf32>
      %c0_11 = arith.constant 0 : index
      %c0_12 = arith.constant 0 : index
      %13 = vector.load %arg7[%c0_11, %c0_12] : memref<8x128xf32, #tpu.memory_space<vmem>>, vector<8x128xf32>
      tpu.vector_store %arg7[%c0_11, %c0_12], %12 {strides = array<i32>} : memref<8x128xf32, #tpu.memory_space<vmem>>, vector<8x128xf32>,
    } else {
    }
    %c0 = arith.constant 0 : index
    %c0_1 = arith.constant 0 : index
    %3 = vector.load %arg7[%c0, %c0_1] : memref<8x128xf32, #tpu.memory_space<vmem>>, vector<8x128xf32>
    %c0_2 = arith.constant 0 : index
    %c0_3 = arith.constant 0 : index
    %4 = vector.load %arg3[%c0_2, %c0_3] : memref<8x128xf32, #tpu.memory_space<vmem>>, vector<8x128xf32>
    %c0_4 = arith.constant 0 : index
    %c0_5 = arith.constant 0 : index
    %5 = vector.load %arg4[%c0_4, %c0_5] : memref<128x128xf32, #tpu.memory_space<vmem>>, vector<128x128xf32>
    %cst = arith.constant dense<0.000000e+00> : vector<8x128xf32>
    %6 = tpu.matmul %4, %5, %cst {dimension_numbers = #tpu.dot_dimension_numbers<[1], [0], [0], [1], [0, 0, 1, 1], [], []>} : vector<8x128xf32>, vector<128x128xf32>, vector<8x128xf32> -> vector<8x128xf32>
    %7 = arith.addf %3, %6 : vector<8x128xf32>
    %c0_6 = arith.constant 0 : index
    %c0_7 = arith.constant 0 : index
    %8 = vector.load %arg7[%c0_6, %c0_7] : memref<8x128xf32, #tpu.memory_space<vmem>>, vector<8x128xf32>
    tpu.vector_store %arg7[%c0_6, %c0_7], %7 {strides = array<i32>} : memref<8x128xf32, #tpu.memory_space<vmem>>, vector<8x128xf32>,
    %c0_i32_8 = arith.constant 0 : i32
    %9 = arith.cmpi eq, %arg2, %c0_i32_8 : i32
    %10 = arith.extui %9 : i1 to i32
    %c0_i32_9 = arith.constant 0 : i32
    %11 = arith.cmpi ne, %10, %c0_i32_9 : i32
    scf.if %11 {
      %c0_10 = arith.constant 0 : index
      %c0_11 = arith.constant 0 : index
      %12 = vector.load %arg7[%c0_10, %c0_11] : memref<8x128xf32, #tpu.memory_space<vmem>>, vector<8x128xf32>
      %c0_12 = arith.constant 0 : index
      %c0_13 = arith.constant 0 : index
      %13 = vector.load %arg5[%c0_12, %c0_13] : memref<1x128xf32, #tpu.memory_space<vmem>>, vector<1x128xf32>
      %14 = vector.broadcast %13 : vector<1x128xf32> to vector<8x128xf32>
      %15 = arith.addf %12, %14 : vector<8x128xf32>
      %c0_14 = arith.constant 0 : index
      %c0_15 = arith.constant 0 : index
      %16 = vector.load %arg6[%c0_14, %c0_15] : memref<8x128xf32, #tpu.memory_space<vmem>>, vector<8x128xf32>
      tpu.vector_store %arg6[%c0_14, %c0_15], %15 {strides = array<i32>} : memref<8x128xf32, #tpu.memory_space<vmem>>, vector<8x128xf32>,
    } else {
    }
    return
  }
  func.func @transform_0(%arg0: i32, %arg1: i32, %arg2: i32) -> (i32, i32) {
    %c0_i32 = arith.constant 0 : i32
    return %arg0, %arg2 : i32, i32
  }
  func.func @transform_1(%arg0: i32, %arg1: i32, %arg2: i32) -> (i32, i32) {
    %c0_i32 = arith.constant 0 : i32
    return %arg2, %arg1 : i32, i32
  }
  func.func @transform_2(%arg0: i32, %arg1: i32, %arg2: i32) -> (i32, i32) {
    %c0_i32 = arith.constant 0 : i32
    %c0_i32_0 = arith.constant 0 : i32
    return %c0_i32, %arg1 : i32, i32
  }
  func.func @transform_3(%arg0: i32, %arg1: i32, %arg2: i32) -> (i32, i32) {
    %c0_i32 = arith.constant 0 : i32
    return %arg0, %arg1 : i32, i32
  }
}

</mosaic_0001>

<bundles_post_ra>
// kernel: tpu_custom_call.1
= control target key start
LH: loop header
LB: loop body
LE: loop exit
PB: predicated region body
PF: predicated region fallthrough
CT: control target
= control target key end

     0   :  { %8 = vsyncpa [#allocation4], 0  ;;  %s1052_s0 = inlined_call_operand.hbm [shape: f32[16,128], index: 0, kind: input, shape index: {}]   ;;  %s1053_s1 = inlined_call_operand.hbm [shape: f32[128,128], index: 1, kind: input, shape index: {}]   ;;  %s1054_s2 = inlined_call_operand.vmem [shape: f32[1,128], index: 2, kind: input, shape index: {}]   ;;  %s1055_s3 = inlined_call_operand.hbm [shape: f32[16,128], index: 3, kind: output, shape index: {}]  }
   0x1   :  { %10 = vsyncpa [#allocation4 + $0x1], 0 }
   0x2   :  { %11 = vsyncpa [#allocation7], 0 }
   0x3   :  { %12 = vsyncpa [#allocation5], 0 }
   0x4   :  { %14 = vsyncpa [#allocation5 + $0x1], 0  ;;  %s828_s12 = smov 0   ;;  %s830_s13 = smov 0  }
   0x5   :  { %s832_s14 = smov 0   ;;  %s834_s15 = smov 0  }
   0x6   :  { %s836_s16 = smov 0   ;;  %s838_s17 = smov 0  }
   0x7 LB: > { %s483_s18 = sadd.s32 4294967295, %s798_s17   ;;  %s484_s19 = sadd.s32 4294967294, %s798_s17   ;;  %s798_s17 = sphi %s838_s17, %s20_s17   ;;  %s794_s16 = sphi %s836_s16, %s1079_s16   ;;  %s790_s15 = sphi %s834_s15, %s1078_s15   ;;  %s786_s14 = sphi %s832_s14, %s1077_s14   ;;  %s782_s13 = sphi %s830_s13, %s1076_s13   ;;  %s778_s12 = sphi %s828_s12, %s1075_s12  }
   0x8   : > { %p61_p0 = scmp.ne.s32.totalorder %s782_s13, %s778_s12  ;;  %p862_p1 = scmp.eq.s32.totalorder %s483_s18, 0 }
   0x9   : > { %p866_p2 = scmp.eq.s32.totalorder %s483_s18, 1  ;;  %p147_p3 = scmp.eq.s32.totalorder %s484_s19, 1 }
   0xa   : > { %s1060_s20 = scalar_select %p862_p1, 1, 0 }
   0xb   : > { %s1061_s21 = scalar_select %p866_p2, 1, 0 }
   0xc   : > { %p872_p4 = por %p862_p1, %p61_p0  ;;  %p485_p5 = scmp.ge.s32.totalorder %s798_s17, 1 }
   0xd   : > { %p877_p6 = por %p147_p3, %p61_p0  ;;  %p154_p7 = scmp.lt.s32.totalorder %s798_s17, 3 }
   0xe   : > { %s1062_s22 = scalar_select %p872_p4, 1, 0 }
   0xf   : > { %s1063_s23 = scalar_select %p877_p6, 1, 0 }
  0x10   : > { %p882_p8 = pnand %p485_p5, %p154_p7  ;;  %s800_s25 = smov [#allocation6]  }
  0x11   : > { %s170_s26 = sshll.u32 %s800_s25, 4  ;;  %s39_s28 = sadd.s32 1, %s794_s16  ;;  %s171_s26 = int_to_ptr.vmem [resolvable:$true] %s170_s26 }
  0x12   : > { %s1064_s24 = scalar_select %p882_p8, 1, 0 }
  0x13   : > { %p584_p9 = pneg %p882_p8  ;;  %s654_s4 = scalar_lea.hbm %s1053_s1, 2048 }
  0x14   : > { %p655_p12 = scmp.ne.s32.totalorder %s1053_s1, %s654_s4  ;;  %p661_p5 = scmp.lt.u32.totalorder %s654_s4, %s1053_s1 }
  0x15   : > { %p891_p11 = pnand %p584_p9, %p862_p1 }
  0x17   : > { %p656_p13 = pneg %p891_p11 }
  0x19   : > { %p657_p0 = pnand %p656_p13, %p655_p12 }
  0x1b   : > { %p658_p3 = pneg %p657_p0 }
  0x1d   : > { %p663_p7 = pnand %p661_p5, %p658_p3 }
  0x1f   : > { %666 = shalt.err (!%p663_p7)
}
  0x20   : > { %s667_s9 = scalar_lea.vmem %s171_s26, 2048  ;;  %p675_p1 = scmp.lt.s32.totalorder %s171_s26, %s171_s26 }
  0x21   : > { %p668_p9 = scmp.ne.s32.totalorder %s171_s26, %s667_s9  ;;  %p676_p4 = scmp.lt.s32.totalorder %s667_s9, %s667_s9 }
  0x23   : > { %p670_p10 = pnand %p668_p9, %p656_p13  ;;  %p677_p8 = por %p676_p4, %p675_p1 }
  0x25   : > { %p671_p6 = pneg %p670_p10 }
  0x27   : > { %p678_p2 = pnand %p677_p8, %p671_p6 }
  0x29   : > { %681 = shalt.err (!%p678_p2)
}
  0x2a   : > { %s801_s10 = smov 128   ;;  %s802_s11 = smov 8  }
  0x2b   : > { %587 = dma.hbm_to_vmem [thread:$0]  (!%p891_p11), %s1053_s1, 2048, %s171_s26, [#allocation7], %s801_s10, %s801_s10, %s802_s11  }
  0x2c   : > { %p41_p1 = scmp.ge.s32.totalorder %s39_s28, 2  ;;  %s48_s25 = sadd.s32 1, %s786_s14 }
  0x2d   : > { %p55_p2 = scmp.ne.s32.totalorder %s786_s14, %s782_s13  ;;  %p56_p4 = scmp.eq.s32.totalorder %s798_s17, 0 }
  0x2e   : > { %s1081_s28 = smov (%p41_p1, %s39_s28), 0  ;;  %p1067_p8 = scmp.ne.s32.totalorder %s1061_s21, 0 }
  0x2f   : > { %p918_p6 = por %p56_p4, %p55_p2  ;;  %s43_s27 = ssub.s32 %s794_s16, %s1081_s28 }
  0x30   : > { %p924_p10 = por %p1067_p8, %p55_p2  ;;  %p597_p12 = scmp.lt.s32.totalorder %s798_s17, 2 }
  0x31   : > { %p46_p11 = scmp.eq.s32.totalorder %s43_s27, 0  ;;  %s190_s26 = sand.u32 1, %s786_s14  }
  0x32   : > { %s489_s4 = sshll.u32 %s190_s26, 3  ;;  %s490_s6 = sshll.u32 %s794_s16, 7 }
  0x33   : > { %s933_s5 = scalar_select %p46_p11, %s786_s14, %s48_s25  }
  0x34   : > { %s939_s9 = scalar_lea.hbm %s1052_s0, %s490_s6  ;;  %s194_s21 = scalar_lea.vmem [#allocation3], %s489_s4 }
  0x35   : > { %s202_s10 = sshll.u32 %s194_s21, 4  ;;  %p945_p13 = pnand %p597_p12, %p918_p6  ;;  %s941_s10 = int_to_ptr.vmem [resolvable:$true] %s202_s10 }
  0x36   : > { %s191_s18 = scalar_lea.sflag [#allocation4], %s190_s26  ;;  %s682_s19 = scalar_lea.hbm %s939_s9, 128 }
  0x37   : > { %p683_p0 = scmp.ne.s32.totalorder %s939_s9, %s682_s19  ;;  %p684_p3 = pneg %p945_p13 }
  0x38   : > { %s687_s4 = scalar_lea.hbm %s1052_s0, 256  ;;  %p688_p9 = scmp.lt.u32.totalorder %s939_s9, %s1052_s0 }
  0x39   : > { %p685_p5 = pnand %p684_p3, %p683_p0  ;;  %p689_p1 = scmp.lt.u32.totalorder %s687_s4, %s682_s19 }
  0x3a   : > { %p691_p4 = scmp.lt.u32.totalorder %s682_s19, %s939_s9 }
  0x3b   : > { %p686_p7 = pneg %p685_p5  ;;  %p690_p2 = por %p689_p1, %p688_p9 }
  0x3d   : > { %p692_p6 = por %p691_p4, %p690_p2 }
  0x3f   : > { %p693_p8 = pnand %p692_p6, %p686_p7 }
  0x41   : > { %696 = shalt.err (!%p693_p8)
}
  0x42   : > { %s697_s26 = scalar_lea.vmem %s941_s10, 128  ;;  %s803_s7 = smov [#allocation3]  }
  0x43   : > { %p698_p12 = scmp.ne.s32.totalorder %s941_s10, %s697_s26  ;;  %s702_s8 = sshll.u32 %s803_s7, 4  ;;  %s703_s8 = int_to_ptr.vmem [resolvable:$false] %s702_s8 }
  0x44   : > { %s704_s21 = scalar_lea.vmem %s703_s8, 256  ;;  %p705_p5 = scmp.lt.s32.totalorder %s941_s10, %s703_s8 }
  0x45   : > { %p700_p11 = pnand %p698_p12, %p684_p3  ;;  %p706_p9 = scmp.lt.s32.totalorder %s704_s21, %s697_s26 }
  0x47   : > { %p701_p0 = pneg %p700_p11  ;;  %p707_p1 = por %p706_p9, %p705_p5 }
  0x49   : > { %p708_p2 = pnand %p707_p1, %p701_p0 }
  0x4b   : > { %711 = shalt.err (!%p708_p2)
}
  0x4c   : > { %591 = dma.hbm_to_vmem [thread:$0]  (!%p945_p13), %s939_s9, 128, %s941_s10, %s191_s18  }
  0x4d   : > { %p1070_p7 = scmp.ne.s32.totalorder %s1064_s24, 0 }
  0x4e   : > { %s977_s19 = sand.u32 (!%p1070_p7), 1, %s782_s13   ;;  %p1071_p3 = scmp.ne.s32.totalorder (!%p1070_p7), %s1062_s22, 0 }
  0x4f   : > { %211 = sbr.rel (%p1070_p7) target bundleno = 353 (0x161), region = 32  ;;  %s492_s25 = sshll.u32 (!%p1070_p7), %s977_s19, 3 }
  0x50   : > { %s214_s27 = scalar_lea.sflag (!%p1070_p7), [#allocation4], %s977_s19  ;;  %s983_s4 = scalar_lea.vmem (!%p1070_p7), [#allocation3], %s492_s25 }
  0x56   : > { %765 = dma.done.wait (%p1071_p3), %s214_s27, 128  }
  0x57   : > { %767 = vsyncadd (%p1071_p3), %s214_s27, 4294967168  ;;  %p1072_p13 = scmp.ne.s32.totalorder %s1060_s20, 0 }
  0x59   : > { %769 = dma.done.wait (%p1072_p13), [#allocation7], 2048  }
  0x5a   : > { %771 = vsyncadd (%p1072_p13), [#allocation7], 4294965248  ;;  %v804_v0 = vmov 0.0|0.0   ;;  %vm805_vm0 = vmmov 0   ;;  %v806_v1 = vmov 0.0   ;;  %v258_v2 = vld [vmem:[#allocation6] sm:$0xff] }
  0x5b   : > { %552 = vmatprep.subr.bf16.mxu0 %v804_v0  ;;  %549 = vmatprep.mubr.msk.f32.mxu0 %vm805_vm0, %v806_v1  ;;  %v259_v3 = vld [vmem:[#allocation6 + $0x8] sm:$0xff]  ;;  %v260_v4 = vld [vmem:[#allocation6 + $0x10] sm:$0xff]  ;;  %v261_v6 = vld [vmem:[#allocation6 + $0x18] sm:$0xff]  ;;  %s497_s24 = sshll.u32 %s790_s15, 7  ;;  %s246_s9 = scalar_lea.vmem [#allocation8], %s492_s25 }
  0x5c   : > { %v553_v5 = vpack.c.bf16 %v259_v3, %v258_v2  ;;  %v556_v7 = vpack.c.bf16 %v261_v6, %v260_v4  ;;  %v262_v8 = vld [vmem:[#allocation6 + $0x20] sm:$0xff]  ;;  %v263_v9 = vld [vmem:[#allocation6 + $0x28] sm:$0xff]  ;;  %v264_v11 = vld [vmem:[#allocation6 + $0x30] sm:$0xff]  ;;  %s374_s10 = sshll.u32 %s246_s9, 4  ;;  %s1003_s29 = scalar_lea.hbm %s1055_s3, %s497_s24  ;;  %s1005_s10 = int_to_ptr.vmem [resolvable:$true] %s374_s10 }
  0x5d   : > { %v559_v10 = vpack.c.bf16 %v263_v9, %v262_v8  ;;  %v265_v12 = vld [vmem:[#allocation6 + $0x38] sm:$0xff]  ;;  %v266_v14 = vld [vmem:[#allocation6 + $0x40] sm:$0xff]  ;;  %v267_v15 = vld [vmem:[#allocation6 + $0x48] sm:$0xff]  ;;  %s360_s6 = scalar_lea.sflag [#allocation5], %s977_s19  ;;  %s712_s26 = scalar_lea.vmem %s1005_s10, 128 }
  0x5e   : > { %554 = vmatpush3.bf16.msra.mxu0 %v553_v5  ;;  %v562_v13 = vpack.c.bf16 %v265_v12, %v264_v11  ;;  %v565_v16 = vpack.c.bf16 %v267_v15, %v266_v14  ;;  %v268_v17 = vld [vmem:[#allocation6 + $0x50] sm:$0xff]  ;;  %v269_v18 = vld [vmem:[#allocation6 + $0x58] sm:$0xff]  ;;  %v270_v20 = vld [vmem:[#allocation6 + $0x60] sm:$0xff]  ;;  %p713_p4 = scmp.ne.s32.totalorder %s1005_s10, %s712_s26  ;;  %s807_s15 = smov [#allocation8]  }
  0x5f   : > { %555 = vmatprep.subr.bf16.mxu0 %v804_v0  ;;  %v568_v19 = vpack.c.bf16 %v269_v18, %v268_v17  ;;  %v271_v21 = vld [vmem:[#allocation6 + $0x68] sm:$0xff]  ;;  %v272_v23 = vld [vmem:[#allocation6 + $0x70] sm:$0xff]  ;;  %v273_v24 = vld [vmem:[#allocation6 + $0x78] sm:$0xff]  ;;  %s716_s7 = sshll.u32 %s807_s15, 4  ;;  %s717_s7 = int_to_ptr.vmem [resolvable:$false] %s716_s7 }
  0x60   : > { %v571_v22 = vpack.c.bf16 %v271_v21, %v270_v20  ;;  %v574_v25 = vpack.c.bf16 %v273_v24, %v272_v23  ;;  %v257_v26 = vld [vmem:[%s983_s4] sm:$0xff]  ;;  %p714_p6 = pnand %p713_p4, %p924_p10  ;;  %s718_s8 = scalar_lea.vmem %s717_s7, 256 }
  0x61   : > { %v495_v27 = vld [vmem:[%s1054_s2] ss:$0 sm:$0xff]  ;;  %p719_p12 = scmp.lt.s32.totalorder %s1005_s10, %s717_s7  ;;  %p720_p11 = scmp.lt.s32.totalorder %s718_s8, %s712_s26 }
  0x62   : > { %557 = vmatpush3.bf16.msra.mxu0 %v556_v7  ;;  %p715_p8 = pneg %p714_p6 }
  0x63   : > { %558 = vmatprep.subr.bf16.mxu0 %v804_v0  ;;  %p721_p0 = por %p720_p11, %p719_p12 }
  0x65   : > { %p722_p5 = pnand %p721_p0, %p715_p8 }
  0x66   : > { %560 = vmatpush3.bf16.msra.mxu0 %v559_v10 }
  0x67   : > { %561 = vmatprep.subr.bf16.mxu0 %v804_v0 }
  0x6a   : > { %563 = vmatpush3.bf16.msra.mxu0 %v562_v13 }
  0x6b   : > { %564 = vmatprep.subr.bf16.mxu0 %v804_v0 }
  0x6e   : > { %566 = vmatpush3.bf16.msra.mxu0 %v565_v16 }
  0x6f   : > { %567 = vmatprep.subr.bf16.mxu0 %v804_v0 }
  0x72   : > { %569 = vmatpush3.bf16.msra.mxu0 %v568_v19 }
  0x73   : > { %570 = vmatprep.subr.bf16.mxu0 %v804_v0 }
  0x76   : > { %572 = vmatpush3.bf16.msra.mxu0 %v571_v22 }
  0x77   : > { %573 = vmatprep.subr.bf16.mxu0 %v804_v0 }
  0x7a   : > { %575 = vmatpush3.bf16.msra.mxu0 %v574_v25 }
  0x7d   : > { %550 = vmatmul.mubr.f32.vlgmr.msra.gmra.mrb[0].mxu0 %v257_v26 }
 0x150   : > { %v340_v28 = vpop.f32.mrb[0].mxu0 }
 0x151   : > { %v357_v29 = vadd.f32 %v495_v27, %v340_v28  ;;  %v551_v30 = vpop.f32.mrb[1].mxu0 }
 0x153   : > { %358 = vst [vmem:[%s246_s9] sm:$0xff] %v357_v29 }
 0x154   : > { %725 = shalt.err (!%p722_p5)
}
 0x155   : > { %s726_s21 = scalar_lea.hbm %s1003_s29, 128  ;;  %s730_s27 = scalar_lea.hbm %s1055_s3, 256 }
 0x156   : > { %p727_p9 = scmp.ne.s32.totalorder %s1003_s29, %s726_s21  ;;  %p731_p7 = scmp.lt.u32.totalorder %s1003_s29, %s1055_s3 }
 0x157   : > { %p732_p3 = scmp.lt.u32.totalorder %s730_s27, %s726_s21  ;;  %p734_p4 = scmp.lt.u32.totalorder %s726_s21, %s1003_s29 }
 0x158   : > { %p728_p1 = pnand %p727_p9, %p924_p10 }
 0x159   : > { %p733_p13 = por %p732_p3, %p731_p7 }
 0x15a   : > { %p729_p2 = pneg %p728_p1 }
 0x15b   : > { %p735_p6 = por %p734_p4, %p733_p13 }
 0x15d   : > { %p736_p8 = pnand %p735_p6, %p729_p2 }
 0x15f   : > { %739 = shalt.err (!%p736_p8)
}
 0x160   : > { %582 = dma.vmem_to_hbm [thread:$0]  (%p924_p10), %s1005_s10, 128, %s1003_s29, %s360_s6  }
 0x161 PF: > { %s386_s22 = sand.u32 1, %s778_s12   ;;  %p1073_p12 = scmp.ne.s32.totalorder %s1063_s23, 0 }
 0x162   : > { %p1074_p11 = scmp.ge.s32.totalorder %s798_s17, 2  ;;  %s387_s24 = scalar_lea.sflag [#allocation5], %s386_s22 }
 0x164   : > { %p593_p0 = pnand %p1074_p11, %p1073_p12 }
 0x166   : > { %773 = dma.done.wait (!%p593_p0), %s387_s24, 128  }
 0x167   : > { %775 = vsyncadd (!%p593_p0), %s387_s24, 4294967168  ;;  %s20_s17 = sadd.s32 1, %s798_s17   ;;  %s1075_s12 = smov %s782_s13 }
 0x168   : > { %p17_p5 = scmp.ge.s32.totalorder %s20_s17, 4   ;;  %s1076_s13 = smov %s786_s14 }
 0x169   : > { %s1077_s14 = smov %s933_s5  ;;  %s1078_s15 = smov %s794_s16 }
 0x16a   : > { %s1079_s16 = smov %s1081_s28  ;;  %19 = sbr.rel (!%p17_p5) target bundleno = 7 (0x7), region = 93 }
 0x171   :  { %392 = vsyncpa [#allocation4], 1 }
 0x172   :  { %394 = vsyncpa [#allocation4 + $0x1], 1 }
 0x173   :  { %395 = vsyncpa [#allocation7], 1 }
 0x174   :  { %396 = vsyncpa [#allocation5], 1 }
 0x175   :  { %398 = vsyncpa [#allocation5 + $0x1], 1 }

</bundles_post_ra>
